<compile_context>
chip_gen: v7x
topology: tpu7x:2x2x1
jax: 0.10.0
libtpu: 0.0.40
codegen_flags: <defaults>
</compile_context>

<pallas_src>
import functools

import jax
import jax.numpy as jnp
from jax.experimental import pallas as pl
from jax.experimental.pallas import tpu as pltpu


def _prelu(x, alpha):
    return jnp.where(x >= 0, x, alpha * x)


# -----------------------------------------------------------------------------
# Fused kernel: all n_iter iterations for one (batch, time-tile) slice
# -----------------------------------------------------------------------------
def recurrent_kernel(mix_ref, w1_ref, b1_ref, w2_ref, b2_ref,
                     wcb_ref, bcb_ref, alpha_ref, o_ref, *, n_iter):
    """mix_ref : (1, Cout, tT) f32
       w1 : (Cin, Cout) bf16    b1 : (Cin, 1) f32
       w2 : (Cout, Cin) bf16    b2 : (Cout, 1) f32
       wcb/bcb : (Cout, 1) f32  (depthwise 1x1 conv of concat_block)
       alpha_ref : (2,) f32 in SMEM -> [UConvBlock PReLU alpha, concat_block PReLU alpha]
    """
    mix = mix_ref[0].astype(jnp.float32)          # (Cout, tT), resident for all iters
    w1 = w1_ref[...]                              # bf16, resident in VMEM
    w2 = w2_ref[...]                              # bf16, resident in VMEM
    b1 = b1_ref[...]
    b2 = b2_ref[...]
    wcb = wcb_ref[...]
    bcb = bcb_ref[...]
    a_unet = alpha_ref[0]                         # SMEM scalar
    a_cb = alpha_ref[1]                           # SMEM scalar

    def uconv(z):
        # proj_1x1 (Cout -> Cin) + PReLU + res_conv (Cin -> Cout) + residual
        h = jnp.dot(w1, z.astype(jnp.bfloat16), preferred_element_type=jnp.float32)
        h = _prelu(h + b1, a_unet)
        y = jnp.dot(w2, h.astype(jnp.bfloat16), preferred_element_type=jnp.float32)
        return y + b2 + z

    def concat_block(x):
        # depthwise 1x1 conv (per-channel scale + bias) + PReLU on (mixture + x)
        z = mix + x
        z = wcb * z + bcb
        return _prelu(z, a_cb)

    x = uconv(mix)                                # iteration 0
    for _ in range(1, n_iter):                    # n_iter is a static Python int
        x = uconv(concat_block(x))

    o_ref[0] = x.astype(o_ref.dtype)              # single lane-dense store


# -----------------------------------------------------------------------------
# Wrapper
# -----------------------------------------------------------------------------
def recurrent_forward(x, params, n_iter=4, t_tile=256, vmem_limit_bytes=None):
    """Fused Pallas implementation of Recurrent.forward."""
    B, C, T = x.shape
    Cin = params["w1"].shape[0]

    t_tile = min(t_tile, T)
    assert T % t_tile == 0, "T must be divisible by the time tile"
    assert t_tile % 128 == 0 and C % 8 == 0, "tile must respect (8, 128) layout"
    n_t = T // t_tile

    w1 = params["w1"].astype(jnp.bfloat16)
    w2 = params["w2"].astype(jnp.bfloat16)
    alphas = params["alphas"].astype(jnp.float32)  # (2,)

    # Advisory cost estimate: two (C x Cin) matmuls per element per iteration.
    flops = 4 * B * T * C * Cin * n_iter
    bytes_accessed = 2 * B * C * T * 4 + 2 * C * Cin * 2 + 4 * C * 4 + Cin * 4

    cparams = pltpu.CompilerParams(
        dimension_semantics=("parallel", "parallel"),
        vmem_limit_bytes=vmem_limit_bytes,
    )

    kernel = functools.partial(recurrent_kernel, n_iter=n_iter)

    return pl.pallas_call(
        kernel,
        out_shape=jax.ShapeDtypeStruct((B, C, T), x.dtype),
        grid=(B, n_t),
        in_specs=[
            pl.BlockSpec((1, C, t_tile), lambda b, t: (b, 0, t)),   # mixture tile
            pl.BlockSpec((Cin, C), lambda b, t: (0, 0)),            # w1 (resident)
            pl.BlockSpec((Cin, 1), lambda b, t: (0, 0)),            # b1
            pl.BlockSpec((C, Cin), lambda b, t: (0, 0)),            # w2 (resident)
            pl.BlockSpec((C, 1), lambda b, t: (0, 0)),              # b2
            pl.BlockSpec((C, 1), lambda b, t: (0, 0)),              # w_cb
            pl.BlockSpec((C, 1), lambda b, t: (0, 0)),              # b_cb
            pl.BlockSpec(memory_space=pltpu.MemorySpace.SMEM),      # PReLU alphas
        ],
        out_specs=pl.BlockSpec((1, C, t_tile), lambda b, t: (b, 0, t)),
        compiler_params=cparams,
        cost_estimate=pl.CostEstimate(flops=flops, transcendentals=0,
                                      bytes_accessed=bytes_accessed),
    )(x, w1, params["b1"], w2, params["b2"],
      params["w_cb"], params["b_cb"], alphas)


# -----------------------------------------------------------------------------
# Pure-JAX reference (same math, bf16 matmuls with f32 accumulation)
# -----------------------------------------------------------------------------
def _uconv_ref(x, p):
    h = jnp.einsum("ij,bjt->bit", p["w1"].astype(jnp.bfloat16), x.astype(jnp.bfloat16),
                   preferred_element_type=jnp.float32) + p["b1"][None]
    h = jnp.where(h >= 0, h, p["alphas"][0] * h)
    y = jnp.einsum("ij,bjt->bit", p["w2"].astype(jnp.bfloat16), h.astype(jnp.bfloat16),
                   preferred_element_type=jnp.float32) + p["b2"][None]
    return y + x


def _concat_ref(mixture, x, p):
    z = mixture + x
    z = p["w_cb"][None] * z + p["b_cb"][None]
    return jnp.where(z >= 0, z, p["alphas"][1] * z)


def recurrent_ref(x, params, n_iter=4):
    mixture = x
    for i in range(n_iter):
        if i == 0:
            x = _uconv_ref(x, params)
        else:
            x = _uconv_ref(_concat_ref(mixture, x, params), params)
    return x


# -----------------------------------------------------------------------------
# Main
# -----------------------------------------------------------------------------
if __name__ == "__main__":
    # Small shapes consistent with the module (out_channels / in_channels scaled down).
    B, COUT, CIN, T = 2, 16, 32, 1024
    N_ITER = 4
    T_TILE = 256   # grid = (2, 4) -> 8 parallel steps

    key = jax.random.PRNGKey(0)
    k = jax.random.split(key, 8)

    params = {
        "w1":   (0.1 * jax.random.normal(k[0], (CIN, COUT))).astype(jnp.float32),
        "b1":   (0.05 * jax.random.normal(k[1], (CIN, 1))).astype(jnp.float32),
        "w2":   (0.1 * jax.random.normal(k[2], (COUT, CIN))).astype(jnp.float32),
        "b2":   (0.05 * jax.random.normal(k[3], (COUT, 1))).astype(jnp.float32),
        "w_cb": (1.0 + 0.1 * jax.random.normal(k[4], (COUT, 1))).astype(jnp.float32),
        "b_cb": (0.05 * jax.random.normal(k[5], (COUT, 1))).astype(jnp.float32),
        # [UConvBlock PReLU alpha, concat_block PReLU alpha] (PyTorch default 0.25)
        "alphas": jnp.array([0.25, 0.25], jnp.float32),
    }

    x = jax.random.normal(k[6], (B, COUT, T), dtype=jnp.float32)

    fwd = jax.jit(lambda xx: recurrent_forward(xx, params, N_ITER, T_TILE))
    out = jax.block_until_ready(fwd(x))

    ref = recurrent_ref(x, params, N_ITER)
    assert out.shape == (B, COUT, T)
    assert jnp.allclose(out, ref, atol=1e-2, rtol=1e-2), \
        "Pallas result mismatch vs JAX reference"

    print("KERNEL_OK")
</pallas_src>

<mosaic_0001>
module attributes {stable_mosaic.version = 11 : i64} {
  func.func @recurrent_kernel(%arg0: i32, %arg1: i32, %arg2: memref<1x16x256xf32, #tpu.memory_space<vmem>>, %arg3: memref<32x16xbf16, #tpu.memory_space<vmem>>, %arg4: memref<32x1xf32, #tpu.memory_space<vmem>>, %arg5: memref<16x32xbf16, #tpu.memory_space<vmem>>, %arg6: memref<16x1xf32, #tpu.memory_space<vmem>>, %arg7: memref<16x1xf32, #tpu.memory_space<vmem>>, %arg8: memref<16x1xf32, #tpu.memory_space<vmem>>, %arg9: memref<2xf32, #tpu.memory_space<smem>>, %arg10: memref<1x16x256xf32, #tpu.memory_space<vmem>>) attributes {dimension_semantics = [#tpu.dimension_semantics<parallel>, #tpu.dimension_semantics<parallel>], iteration_bounds = array<i64: 2, 4>, scalar_prefetch = 0 : i64, scratch_operands = 0 : i64, tpu.core_type = #tpu.core_type<tc>, window_params = [{transform_indices = @transform_0, window_bounds = array<i64: 1, 16, 256>}, {pipeline_mode = #tpu.pipeline_mode<synchronous>, transform_indices = @transform_1, window_bounds = array<i64: 32, 16>}, {pipeline_mode = #tpu.pipeline_mode<synchronous>, transform_indices = @transform_2, window_bounds = array<i64: 32, 1>}, {pipeline_mode = #tpu.pipeline_mode<synchronous>, transform_indices = @transform_3, window_bounds = array<i64: 16, 32>}, {pipeline_mode = #tpu.pipeline_mode<synchronous>, transform_indices = @transform_4, window_bounds = array<i64: 16, 1>}, {pipeline_mode = #tpu.pipeline_mode<synchronous>, transform_indices = @transform_5, window_bounds = array<i64: 16, 1>}, {pipeline_mode = #tpu.pipeline_mode<synchronous>, transform_indices = @transform_6, window_bounds = array<i64: 16, 1>}, {transform_indices = @transform_7, window_bounds = array<i64: 2>}, {transform_indices = @transform_8, window_bounds = array<i64: 1, 16, 256>}]} {
    %c0 = arith.constant 0 : index
    %c0_0 = arith.constant 0 : index
    %c0_1 = arith.constant 0 : index
    %0 = vector.load %arg2[%c0, %c0_0, %c0_1] : memref<1x16x256xf32, #tpu.memory_space<vmem>>, vector<1x16x256xf32>
    %1 = vector.shape_cast %0 : vector<1x16x256xf32> to vector<16x256xf32>
    %c0_2 = arith.constant 0 : index
    %c0_3 = arith.constant 0 : index
    %2 = vector.load %arg3[%c0_2, %c0_3] : memref<32x16xbf16, #tpu.memory_space<vmem>>, vector<32x16xbf16>
    %c0_4 = arith.constant 0 : index
    %c0_5 = arith.constant 0 : index
    %3 = vector.load %arg5[%c0_4, %c0_5] : memref<16x32xbf16, #tpu.memory_space<vmem>>, vector<16x32xbf16>
    %c0_6 = arith.constant 0 : index
    %c0_7 = arith.constant 0 : index
    %4 = vector.load %arg4[%c0_6, %c0_7] : memref<32x1xf32, #tpu.memory_space<vmem>>, vector<32x1xf32>
    %c0_8 = arith.constant 0 : index
    %c0_9 = arith.constant 0 : index
    %5 = vector.load %arg6[%c0_8, %c0_9] : memref<16x1xf32, #tpu.memory_space<vmem>>, vector<16x1xf32>
    %c0_10 = arith.constant 0 : index
    %c0_11 = arith.constant 0 : index
    %6 = vector.load %arg7[%c0_10, %c0_11] : memref<16x1xf32, #tpu.memory_space<vmem>>, vector<16x1xf32>
    %c0_12 = arith.constant 0 : index
    %c0_13 = arith.constant 0 : index
    %7 = vector.load %arg8[%c0_12, %c0_13] : memref<16x1xf32, #tpu.memory_space<vmem>>, vector<16x1xf32>
    %c0_14 = arith.constant 0 : index
    %8 = memref.load %arg9[%c0_14] : memref<2xf32, #tpu.memory_space<smem>>
    %c1 = arith.constant 1 : index
    %9 = memref.load %arg9[%c1] : memref<2xf32, #tpu.memory_space<smem>>
    %10 = arith.truncf %1 : vector<16x256xf32> to vector<16x256xbf16>
    %cst = arith.constant dense<0.000000e+00> : vector<32x256xf32>
    %11 = tpu.matmul %2, %10, %cst {dimension_numbers = #tpu.dot_dimension_numbers<[1], [0], [0], [1], [0, 0, 1, 1], [], []>} : vector<32x16xbf16>, vector<16x256xbf16>, vector<32x256xf32> -> vector<32x256xf32>
    %12 = vector.broadcast %4 : vector<32x1xf32> to vector<32x256xf32>
    %13 = arith.addf %11, %12 : vector<32x256xf32>
    %cst_15 = arith.constant 0.000000e+00 : f32
    %14 = vector.broadcast %cst_15 : f32 to vector<32x256xf32>
    %15 = arith.cmpf oge, %13, %14 : vector<32x256xf32>
    %16 = vector.broadcast %8 : f32 to vector<32x256xf32>
    %17 = arith.mulf %16, %13 : vector<32x256xf32>
    %18 = arith.select %15, %13, %17 : vector<32x256xi1>, vector<32x256xf32>
    %19 = arith.truncf %18 : vector<32x256xf32> to vector<32x256xbf16>
    %cst_16 = arith.constant dense<0.000000e+00> : vector<16x256xf32>
    %20 = tpu.matmul %3, %19, %cst_16 {dimension_numbers = #tpu.dot_dimension_numbers<[1], [0], [0], [1], [0, 0, 1, 1], [], []>} : vector<16x32xbf16>, vector<32x256xbf16>, vector<16x256xf32> -> vector<16x256xf32>
    %21 = vector.broadcast %5 : vector<16x1xf32> to vector<16x256xf32>
    %22 = arith.addf %20, %21 : vector<16x256xf32>
    %23 = arith.addf %22, %1 : vector<16x256xf32>
    %24 = arith.addf %1, %23 : vector<16x256xf32>
    %25 = vector.broadcast %6 : vector<16x1xf32> to vector<16x256xf32>
    %26 = arith.mulf %25, %24 : vector<16x256xf32>
    %27 = vector.broadcast %7 : vector<16x1xf32> to vector<16x256xf32>
    %28 = arith.addf %26, %27 : vector<16x256xf32>
    %cst_17 = arith.constant 0.000000e+00 : f32
    %29 = vector.broadcast %cst_17 : f32 to vector<16x256xf32>
    %30 = arith.cmpf oge, %28, %29 : vector<16x256xf32>
    %31 = vector.broadcast %9 : f32 to vector<16x256xf32>
    %32 = arith.mulf %31, %28 : vector<16x256xf32>
    %33 = arith.select %30, %28, %32 : vector<16x256xi1>, vector<16x256xf32>
    %34 = arith.truncf %33 : vector<16x256xf32> to vector<16x256xbf16>
    %cst_18 = arith.constant dense<0.000000e+00> : vector<32x256xf32>
    %35 = tpu.matmul %2, %34, %cst_18 {dimension_numbers = #tpu.dot_dimension_numbers<[1], [0], [0], [1], [0, 0, 1, 1], [], []>} : vector<32x16xbf16>, vector<16x256xbf16>, vector<32x256xf32> -> vector<32x256xf32>
    %36 = vector.broadcast %4 : vector<32x1xf32> to vector<32x256xf32>
    %37 = arith.addf %35, %36 : vector<32x256xf32>
    %cst_19 = arith.constant 0.000000e+00 : f32
    %38 = vector.broadcast %cst_19 : f32 to vector<32x256xf32>
    %39 = arith.cmpf oge, %37, %38 : vector<32x256xf32>
    %40 = vector.broadcast %8 : f32 to vector<32x256xf32>
    %41 = arith.mulf %40, %37 : vector<32x256xf32>
    %42 = arith.select %39, %37, %41 : vector<32x256xi1>, vector<32x256xf32>
    %43 = arith.truncf %42 : vector<32x256xf32> to vector<32x256xbf16>
    %cst_20 = arith.constant dense<0.000000e+00> : vector<16x256xf32>
    %44 = tpu.matmul %3, %43, %cst_20 {dimension_numbers = #tpu.dot_dimension_numbers<[1], [0], [0], [1], [0, 0, 1, 1], [], []>} : vector<16x32xbf16>, vector<32x256xbf16>, vector<16x256xf32> -> vector<16x256xf32>
    %45 = vector.broadcast %5 : vector<16x1xf32> to vector<16x256xf32>
    %46 = arith.addf %44, %45 : vector<16x256xf32>
    %47 = arith.addf %46, %33 : vector<16x256xf32>
    %48 = arith.addf %1, %47 : vector<16x256xf32>
    %49 = vector.broadcast %6 : vector<16x1xf32> to vector<16x256xf32>
    %50 = arith.mulf %49, %48 : vector<16x256xf32>
    %51 = vector.broadcast %7 : vector<16x1xf32> to vector<16x256xf32>
    %52 = arith.addf %50, %51 : vector<16x256xf32>
    %cst_21 = arith.constant 0.000000e+00 : f32
    %53 = vector.broadcast %cst_21 : f32 to vector<16x256xf32>
    %54 = arith.cmpf oge, %52, %53 : vector<16x256xf32>
    %55 = vector.broadcast %9 : f32 to vector<16x256xf32>
    %56 = arith.mulf %55, %52 : vector<16x256xf32>
    %57 = arith.select %54, %52, %56 : vector<16x256xi1>, vector<16x256xf32>
    %58 = arith.truncf %57 : vector<16x256xf32> to vector<16x256xbf16>
    %cst_22 = arith.constant dense<0.000000e+00> : vector<32x256xf32>
    %59 = tpu.matmul %2, %58, %cst_22 {dimension_numbers = #tpu.dot_dimension_numbers<[1], [0], [0], [1], [0, 0, 1, 1], [], []>} : vector<32x16xbf16>, vector<16x256xbf16>, vector<32x256xf32> -> vector<32x256xf32>
    %60 = vector.broadcast %4 : vector<32x1xf32> to vector<32x256xf32>
    %61 = arith.addf %59, %60 : vector<32x256xf32>
    %cst_23 = arith.constant 0.000000e+00 : f32
    %62 = vector.broadcast %cst_23 : f32 to vector<32x256xf32>
    %63 = arith.cmpf oge, %61, %62 : vector<32x256xf32>
    %64 = vector.broadcast %8 : f32 to vector<32x256xf32>
    %65 = arith.mulf %64, %61 : vector<32x256xf32>
    %66 = arith.select %63, %61, %65 : vector<32x256xi1>, vector<32x256xf32>
    %67 = arith.truncf %66 : vector<32x256xf32> to vector<32x256xbf16>
    %cst_24 = arith.constant dense<0.000000e+00> : vector<16x256xf32>
    %68 = tpu.matmul %3, %67, %cst_24 {dimension_numbers = #tpu.dot_dimension_numbers<[1], [0], [0], [1], [0, 0, 1, 1], [], []>} : vector<16x32xbf16>, vector<32x256xbf16>, vector<16x256xf32> -> vector<16x256xf32>
    %69 = vector.broadcast %5 : vector<16x1xf32> to vector<16x256xf32>
    %70 = arith.addf %68, %69 : vector<16x256xf32>
    %71 = arith.addf %70, %57 : vector<16x256xf32>
    %72 = arith.addf %1, %71 : vector<16x256xf32>
    %73 = vector.broadcast %6 : vector<16x1xf32> to vector<16x256xf32>
    %74 = arith.mulf %73, %72 : vector<16x256xf32>
    %75 = vector.broadcast %7 : vector<16x1xf32> to vector<16x256xf32>
    %76 = arith.addf %74, %75 : vector<16x256xf32>
    %cst_25 = arith.constant 0.000000e+00 : f32
    %77 = vector.broadcast %cst_25 : f32 to vector<16x256xf32>
    %78 = arith.cmpf oge, %76, %77 : vector<16x256xf32>
    %79 = vector.broadcast %9 : f32 to vector<16x256xf32>
    %80 = arith.mulf %79, %76 : vector<16x256xf32>
    %81 = arith.select %78, %76, %80 : vector<16x256xi1>, vector<16x256xf32>
    %82 = arith.truncf %81 : vector<16x256xf32> to vector<16x256xbf16>
    %cst_26 = arith.constant dense<0.000000e+00> : vector<32x256xf32>
    %83 = tpu.matmul %2, %82, %cst_26 {dimension_numbers = #tpu.dot_dimension_numbers<[1], [0], [0], [1], [0, 0, 1, 1], [], []>} : vector<32x16xbf16>, vector<16x256xbf16>, vector<32x256xf32> -> vector<32x256xf32>
    %84 = vector.broadcast %4 : vector<32x1xf32> to vector<32x256xf32>
    %85 = arith.addf %83, %84 : vector<32x256xf32>
    %cst_27 = arith.constant 0.000000e+00 : f32
    %86 = vector.broadcast %cst_27 : f32 to vector<32x256xf32>
    %87 = arith.cmpf oge, %85, %86 : vector<32x256xf32>
    %88 = vector.broadcast %8 : f32 to vector<32x256xf32>
    %89 = arith.mulf %88, %85 : vector<32x256xf32>
    %90 = arith.select %87, %85, %89 : vector<32x256xi1>, vector<32x256xf32>
    %91 = arith.truncf %90 : vector<32x256xf32> to vector<32x256xbf16>
    %cst_28 = arith.constant dense<0.000000e+00> : vector<16x256xf32>
    %92 = tpu.matmul %3, %91, %cst_28 {dimension_numbers = #tpu.dot_dimension_numbers<[1], [0], [0], [1], [0, 0, 1, 1], [], []>} : vector<16x32xbf16>, vector<32x256xbf16>, vector<16x256xf32> -> vector<16x256xf32>
    %93 = vector.broadcast %5 : vector<16x1xf32> to vector<16x256xf32>
    %94 = arith.addf %92, %93 : vector<16x256xf32>
    %95 = arith.addf %94, %81 : vector<16x256xf32>
    %c0_29 = arith.constant 0 : index
    %c0_30 = arith.constant 0 : index
    %c0_31 = arith.constant 0 : index
    %96 = vector.load %arg10[%c0_29, %c0_30, %c0_31] : memref<1x16x256xf32, #tpu.memory_space<vmem>>, vector<1x16x256xf32>
    %97 = vector.shape_cast %96 : vector<1x16x256xf32> to vector<16x256xf32>
    %98 = vector.shape_cast %95 : vector<16x256xf32> to vector<1x16x256xf32>
    tpu.vector_store %arg10[%c0_29, %c0_30, %c0_31], %98 {strides = array<i32>} : memref<1x16x256xf32, #tpu.memory_space<vmem>>, vector<1x16x256xf32>,
    return
  }
  func.func @transform_0(%arg0: i32, %arg1: i32) -> (i32, i32, i32) {
    %c0_i32 = arith.constant 0 : i32
    %c0_i32_0 = arith.constant 0 : i32
    return %arg0, %c0_i32, %arg1 : i32, i32, i32
  }
  func.func @transform_1(%arg0: i32, %arg1: i32) -> (i32, i32) {
    %c0_i32 = arith.constant 0 : i32
    %c0_i32_0 = arith.constant 0 : i32
    %c0_i32_1 = arith.constant 0 : i32
    return %c0_i32, %c0_i32_0 : i32, i32
  }
  func.func @transform_2(%arg0: i32, %arg1: i32) -> (i32, i32) {
    %c0_i32 = arith.constant 0 : i32
    %c0_i32_0 = arith.constant 0 : i32
    %c0_i32_1 = arith.constant 0 : i32
    return %c0_i32, %c0_i32_0 : i32, i32
  }
  func.func @transform_3(%arg0: i32, %arg1: i32) -> (i32, i32) {
    %c0_i32 = arith.constant 0 : i32
    %c0_i32_0 = arith.constant 0 : i32
    %c0_i32_1 = arith.constant 0 : i32
    return %c0_i32, %c0_i32_0 : i32, i32
  }
  func.func @transform_4(%arg0: i32, %arg1: i32) -> (i32, i32) {
    %c0_i32 = arith.constant 0 : i32
    %c0_i32_0 = arith.constant 0 : i32
    %c0_i32_1 = arith.constant 0 : i32
    return %c0_i32, %c0_i32_0 : i32, i32
  }
  func.func @transform_5(%arg0: i32, %arg1: i32) -> (i32, i32) {
    %c0_i32 = arith.constant 0 : i32
    %c0_i32_0 = arith.constant 0 : i32
    %c0_i32_1 = arith.constant 0 : i32
    return %c0_i32, %c0_i32_0 : i32, i32
  }
  func.func @transform_6(%arg0: i32, %arg1: i32) -> (i32, i32) {
    %c0_i32 = arith.constant 0 : i32
    %c0_i32_0 = arith.constant 0 : i32
    %c0_i32_1 = arith.constant 0 : i32
    return %c0_i32, %c0_i32_0 : i32, i32
  }
  func.func @transform_7(%arg0: i32, %arg1: i32) -> i32 {
    %c0_i32 = arith.constant 0 : i32
    %c0_i32_0 = arith.constant 0 : i32
    return %c0_i32 : i32
  }
  func.func @transform_8(%arg0: i32, %arg1: i32) -> (i32, i32, i32) {
    %c0_i32 = arith.constant 0 : i32
    %c0_i32_0 = arith.constant 0 : i32
    return %arg0, %c0_i32, %arg1 : i32, i32, i32
  }
}

</mosaic_0001>

<bundles_post_ra>
// kernel: _lambda_.1
= control target key start
LH: loop header
LB: loop body
LE: loop exit
PB: predicated region body
PF: predicated region fallthrough
CT: control target
= control target key end

     0   :  { %s2407_s0 = inlined_call_operand.hbm [shape: f32[2,16,1024], index: 0, kind: input, shape index: {}]   ;;  %s2408_s1 = inlined_call_operand.vmem [shape: bf16[32,16], index: 1, kind: input, shape index: {}]   ;;  %s2409_s2 = inlined_call_operand.hbm [shape: f32[32,1], index: 2, kind: input, shape index: {}]   ;;  %s2410_s3 = inlined_call_operand.vmem [shape: bf16[16,32], index: 3, kind: input, shape index: {}]   ;;  %s2411_s4 = inlined_call_operand.hbm [shape: f32[16,1], index: 4, kind: input, shape index: {}]   ;;  %s2412_s5 = inlined_call_operand.hbm [shape: f32[16,1], index: 5, kind: input, shape index: {}]   ;;  %s2413_s6 = inlined_call_operand.hbm [shape: f32[16,1], index: 6, kind: input, shape index: {}]   ;;  %s2414_s7 = inlined_call_operand.vmem [shape: f32[2], index: 7, kind: input, shape index: {}]   ;;  %s2415_s8 = inlined_call_operand.hbm [shape: f32[2,16,1024], index: 8, kind: output, shape index: {}]  }
   0x1   :  { %2424 = sst [smem:[#allocation23_spill]] %s2408_s1 }
   0x2   :  { %2425 = sst [smem:[#allocation24_spill]] %s2409_s2 }
   0x3   :  { %2426 = sst [smem:[#allocation25_spill]] %s2410_s3 }
   0x4   :  { %2427 = sst [smem:[#allocation26_spill]] %s2411_s4 }
   0x5   :  { %2428 = sst [smem:[#allocation27_spill]] %s2412_s5 }
   0x6   :  { %2429 = sst [smem:[#allocation28_spill]] %s2415_s8 }
   0x7   :  { %13 = vsyncpa [#allocation3], 0 }
   0x8   :  { %15 = vsyncpa [#allocation3 + $0x1], 0 }
   0x9   :  { %16 = vsyncpa [#allocation7], 0 }
   0xa   :  { %17 = vsyncpa [#allocation10], 0 }
   0xb   :  { %18 = vsyncpa [#allocation5], 0 }
   0xc   :  { %19 = vsyncpa [#allocation4], 0 }
   0xd   :  { %21 = vsyncpa [#allocation4 + $0x1], 0  ;;  %s1785_s27 = smov 0   ;;  %s1787_s28 = smov 0  }
   0xe   :  { %s1789_s29 = smov 0   ;;  %s1791_s30 = smov 0  }
   0xf   :  { %s1793_s9 = smov 0   ;;  %s1795_s10 = smov 0  }
  0x10   :  { %s1797_s11 = smov 0   ;;  %s1799_s12 = smov 0  }
  0x11 LB: > { %2430 = sst [smem:[#allocation19_spill]] %s1694_s27  ;;  %s1269_s13 = sadd.s32 4294967295, %s1722_s12   ;;  %s1722_s12 = sphi %s1799_s12, %s27_s12   ;;  %s1718_s11 = sphi %s1797_s11, %s2465_s11   ;;  %s1714_s10 = sphi %s1795_s10, %s2464_s10   ;;  %s1710_s9 = sphi %s1793_s9, %s2463_s9   ;;  %s1706_s30 = sphi %s1791_s30, %s2462_s30   ;;  %s1702_s29 = sphi %s1789_s29, %s2461_s29   ;;  %s1698_s28 = sphi %s1787_s28, %s2460_s28   ;;  %s1694_s27 = sphi %s1785_s27, %s2459_s27  }
  0x12   : > { %2431 = sst [smem:[#allocation20_spill]] %s1706_s30  ;;  %s1270_s14 = sadd.s32 4294967294, %s1722_s12  }
  0x13   : > { %2432 = sst [smem:[#allocation21_spill]] %s1710_s9  ;;  %p61_p0 = scmp.ne.s32.totalorder %s1698_s28, %s1694_s27 }
  0x14   : > { %p1829_p1 = scmp.eq.s32.totalorder %s1269_s13, 0  ;;  %p1833_p2 = scmp.eq.s32.totalorder %s1269_s13, 7 }
  0x15   : > { %p240_p3 = scmp.eq.s32.totalorder %s1270_s14, 7  ;;  %p1271_p5 = scmp.ge.s32.totalorder %s1722_s12, 1 }
  0x16   : > { %s2433_s15 = scalar_select %p1829_p1, 1, 0 }
  0x17   : > { %s2434_s16 = scalar_select %p1833_p2, 1, 0 }
  0x18   : > { %p1839_p4 = por %p1829_p1, %p61_p0  ;;  %p1844_p6 = por %p240_p3, %p61_p0 }
  0x19   : > { %p247_p7 = scmp.lt.s32.totalorder %s1722_s12, 9  ;;  %s1724_s20 = smov [#allocation6]  }
  0x1a   : > { %s2435_s17 = scalar_select %p1839_p4, 1, 0 }
  0x1b   : > { %s2436_s18 = scalar_select %p1844_p6, 1, 0 }
  0x1c   : > { %p1849_p8 = pnand %p1271_p5, %p247_p7  ;;  %s262_s21 = sshll.u32 %s1724_s20, 4  ;;  %s1853_s21 = int_to_ptr.vmem [resolvable:$true] %s262_s21 }
  0x1d   : > { %2437 = sst [smem:[#allocation22_spill]] %s2436_s18  ;;  %s1725_s23 = smov [#allocation9]  }
  0x1e   : > { %s2438_s19 = scalar_select %p1849_p8, 1, 0 }
  0x1f   : > { %p1336_p9 = pneg %p1849_p8  ;;  %s291_s24 = sshll.u32 %s1725_s23, 4  ;;  %s1863_s24 = int_to_ptr.vmem [resolvable:$true] %s291_s24 }
  0x20   : > { %s1726_s25 = smov [#allocation8]   ;;  %s2440_s2 = sld [smem:[#allocation24_spill]] }
  0x21   : > { %p1859_p10 = pnand %p1336_p9, %p1829_p1  ;;  %s1865_s26 = sshll.u32 %s1726_s25, 4  ;;  %s279_s26 = int_to_ptr.vmem [resolvable:$true] %s1865_s26 }
  0x23   : > { %p1875_p12 = pneg %p1859_p10 }
  0x26   : > { %s1455_s20 = scalar_lea.hbm %s2440_s2, 512 }
  0x27   : > { %p1456_p11 = scmp.ne.s32.totalorder %s2440_s2, %s1455_s20  ;;  %p1462_p3 = scmp.lt.u32.totalorder %s1455_s20, %s2440_s2 }
  0x29   : > { %p1458_p13 = pnand %p1875_p12, %p1456_p11 }
  0x2b   : > { %p1459_p0 = pneg %p1458_p13 }
  0x2d   : > { %p1464_p5 = pnand %p1462_p3, %p1459_p0 }
  0x2f   : > { %1467 = shalt.err (!%p1464_p5)
}
  0x30   : > { %s1468_s27 = scalar_lea.vmem %s1853_s21, 512  ;;  %p1476_p1 = scmp.lt.s32.totalorder %s1853_s21, %s1853_s21 }
  0x31   : > { %p1469_p7 = scmp.ne.s32.totalorder %s1853_s21, %s1468_s27  ;;  %p1477_p4 = scmp.lt.s32.totalorder %s1468_s27, %s1468_s27 }
  0x33   : > { %p1471_p9 = pnand %p1469_p7, %p1875_p12  ;;  %p1478_p11 = por %p1477_p4, %p1476_p1 }
  0x35   : > { %p1472_p6 = pneg %p1471_p9 }
  0x37   : > { %p1479_p13 = pnand %p1478_p11, %p1472_p6 }
  0x39   : > { %1482 = shalt.err (!%p1479_p13)
}
  0x3a   : > { %s1727_s18 = smov 128   ;;  %s1728_s13 = smov 8  }
  0x3b   : > { %1339 = dma.hbm_to_vmem [thread:$0]  (!%p1859_p10), %s2440_s2, 512, %s1853_s21, [#allocation7], %s1727_s18, %s1727_s18, %s1728_s13  }
  0x3c   : > { %s2442_s5 = sld [smem:[#allocation27_spill]] }
  0x42   : > { %s1483_s27 = scalar_lea.hbm %s2442_s5, 256 }
  0x43   : > { %p1484_p1 = scmp.ne.s32.totalorder %s2442_s5, %s1483_s27  ;;  %p1490_p0 = scmp.lt.u32.totalorder %s1483_s27, %s2442_s5 }
  0x45   : > { %p1486_p4 = pnand %p1484_p1, %p1875_p12 }
  0x47   : > { %p1487_p6 = pneg %p1486_p4 }
  0x49   : > { %p1492_p3 = pnand %p1490_p0, %p1487_p6 }
  0x4b   : > { %1495 = shalt.err (!%p1492_p3)
}
  0x4c   : > { %s1496_s21 = scalar_lea.vmem %s1863_s24, 256  ;;  %p1504_p11 = scmp.lt.s32.totalorder %s1863_s24, %s1863_s24 }
  0x4d   : > { %p1497_p5 = scmp.ne.s32.totalorder %s1863_s24, %s1496_s21  ;;  %p1505_p13 = scmp.lt.s32.totalorder %s1496_s21, %s1496_s21 }
  0x4f   : > { %p1499_p7 = pnand %p1497_p5, %p1875_p12  ;;  %p1506_p1 = por %p1505_p13, %p1504_p11 }
  0x51   : > { %p1500_p9 = pneg %p1499_p7 }
  0x53   : > { %p1507_p4 = pnand %p1506_p1, %p1500_p9 }
  0x55   : > { %1510 = shalt.err (!%p1507_p4)
}
  0x56   : > { %1345 = dma.hbm_to_vmem [thread:$0]  (!%p1859_p10), %s2442_s5, 256, %s1863_s24, [#allocation10], %s1727_s18, %s1727_s18, %s1728_s13  }
  0x57   : > { %s2443_s4 = sld [smem:[#allocation26_spill]] }
  0x5d   : > { %s1511_s14 = scalar_lea.hbm %s2443_s4, 256 }
  0x5e   : > { %p1512_p6 = scmp.ne.s32.totalorder %s2443_s4, %s1511_s14  ;;  %p1518_p5 = scmp.lt.u32.totalorder %s1511_s14, %s2443_s4 }
  0x60   : > { %p1514_p0 = pnand %p1512_p6, %p1875_p12 }
  0x62   : > { %p1515_p3 = pneg %p1514_p0 }
  0x64   : > { %p1520_p7 = pnand %p1518_p5, %p1515_p3 }
  0x66   : > { %1523 = shalt.err (!%p1520_p7)
}
  0x67   : > { %s1524_s21 = scalar_lea.vmem %s279_s26, 256  ;;  %p1532_p1 = scmp.lt.s32.totalorder %s279_s26, %s279_s26 }
  0x68   : > { %p1525_p9 = scmp.ne.s32.totalorder %s279_s26, %s1524_s21  ;;  %p1533_p4 = scmp.lt.s32.totalorder %s1524_s21, %s1524_s21 }
  0x6a   : > { %p1527_p11 = pnand %p1525_p9, %p1875_p12  ;;  %p1534_p8 = por %p1533_p4, %p1532_p1 }
  0x6c   : > { %p1528_p13 = pneg %p1527_p11 }
  0x6e   : > { %p1535_p2 = pnand %p1534_p8, %p1528_p13 }
  0x70   : > { %1538 = shalt.err (!%p1535_p2)
}
  0x71   : > { %1342 = dma.hbm_to_vmem [thread:$0]  (!%p1859_p10), %s2443_s4, 256, %s279_s26, [#allocation7], %s1727_s18, %s1727_s18, %s1728_s13  }
  0x72   : > { %s1729_s3 = smov [#allocation11]   ;;  %s318_s20 = sshll.u32 %s2414_s7, 4  ;;  %s319_s20 = int_to_ptr.vmem [resolvable:$true] %s318_s20 }
  0x73   : > { %s304_s30 = sshll.u32 %s1729_s3, 4  ;;  %s1539_s27 = scalar_lea.hbm %s2413_s6, 256  ;;  %s305_s30 = int_to_ptr.vmem [resolvable:$true] %s304_s30 }
  0x74   : > { %p1540_p2 = scmp.ne.s32.totalorder %s2413_s6, %s1539_s27  ;;  %p1546_p0 = scmp.lt.u32.totalorder %s1539_s27, %s2413_s6 }
  0x76   : > { %p1542_p8 = pnand %p1540_p2, %p1875_p12 }
  0x78   : > { %p1543_p6 = pneg %p1542_p8 }
  0x7a   : > { %p1548_p3 = pnand %p1546_p0, %p1543_p6 }
  0x7c   : > { %1551 = shalt.err (!%p1548_p3)
}
  0x7d   : > { %s1552_s1 = scalar_lea.vmem %s305_s30, 256  ;;  %p1560_p11 = scmp.lt.s32.totalorder %s305_s30, %s305_s30 }
  0x7e   : > { %p1553_p5 = scmp.ne.s32.totalorder %s305_s30, %s1552_s1  ;;  %p1561_p13 = scmp.lt.s32.totalorder %s1552_s1, %s1552_s1 }
  0x80   : > { %p1555_p7 = pnand %p1553_p5, %p1875_p12  ;;  %p1562_p1 = por %p1561_p13, %p1560_p11 }
  0x82   : > { %p1556_p9 = pneg %p1555_p7 }
  0x84   : > { %p1563_p4 = pnand %p1562_p1, %p1556_p9 }
  0x86   : > { %1566 = shalt.err (!%p1563_p4)
}
  0x87   : > { %1348 = dma.hbm_to_vmem [thread:$0]  (!%p1859_p10), %s2413_s6, 256, %s305_s30, [#allocation10], %s1727_s18, %s1727_s18, %s1728_s13  }
  0x88   : > { %s1567_s9 = scalar_lea.vmem %s319_s20, 16  ;;  %p1575_p0 = scmp.lt.s32.totalorder %s319_s20, %s319_s20 }
  0x89   : > { %p1568_p2 = scmp.ne.s32.totalorder %s319_s20, %s1567_s9  ;;  %p1576_p3 = scmp.lt.s32.totalorder %s1567_s9, %s1567_s9 }
  0x8b   : > { %p1570_p8 = pnand %p1568_p2, %p1875_p12  ;;  %p1577_p5 = por %p1576_p3, %p1575_p0 }
  0x8d   : > { %p1571_p6 = pneg %p1570_p8 }
  0x8f   : > { %p1578_p7 = pnand %p1577_p5, %p1571_p6 }
  0x91   : > { %1581 = shalt.err (!%p1578_p7)
}
  0x92   : > { %s1730_s14 = smov [#allocation12]   ;;  %s36_s8 = sadd.s32 1, %s1714_s10 }
  0x93   : > { %1351 = dma.vmem_to_smem (!%p1859_p10), %s319_s20, 16, %s1730_s14, [#allocation5]  }
  0x94   : > { %p37_p12 = scmp.ge.s32.totalorder %s36_s8, 4  ;;  %s39_s18 = sadd.s32 1, %s1718_s11 }
  0x95   : > { %s48_s13 = sadd.s32 1, %s1702_s29  ;;  %p55_p9 = scmp.ne.s32.totalorder %s1702_s29, %s1698_s28 }
  0x96   : > { %s2467_s8 = smov (%p37_p12, %s36_s8), 0  ;;  %s2469_s18 = smov (!%p37_p12, %s39_s18), %s1718_s11 }
  0x97   : > { %s44_s22 = ssub.s32 %s1714_s10, %s2467_s8  ;;  %p56_p11 = scmp.eq.s32.totalorder %s1722_s12, 0 }
  0x98   : > { %p41_p13 = scmp.ge.s32.totalorder %s2469_s18, 2  ;;  %p2444_p1 = scmp.ne.s32.totalorder %s2434_s16, 0 }
  0x99   : > { %p1992_p10 = por %p56_p11, %p55_p9  ;;  %p1365_p2 = scmp.lt.s32.totalorder %s1722_s12, 8 }
  0x9a   : > { %p1988_p4 = por %p2444_p1, %p55_p9  ;;  %s2471_s18 = smov (%p41_p13, %s2469_s18), 0 }
  0x9b   : > { %s329_s23 = sand.u32 1, %s1702_s29   ;;  %s1279_s25 = sshll.u32 %s1714_s10, 1 }
  0x9c   : > { %s43_s27 = ssub.s32 %s1718_s11, %s2471_s18  ;;  %s1278_s26 = sshll.u32 %s329_s23, 5 }
  0x9d   : > { %s45_s21 = sor.u32 %s44_s22, %s43_s27  ;;  %s1280_s16 = sshll.u32 %s1718_s11, 4 }
  0x9e   : > { %p46_p8 = scmp.eq.s32.totalorder %s45_s21, 0  ;;  %s333_s24 = scalar_lea.vmem [#allocation2], %s1278_s26 }
  0x9f   : > { %s342_s1 = sshll.u32 %s333_s24, 4  ;;  %s339_s3 = sadd.s32 %s1280_s16, %s1279_s25  ;;  %s2007_s1 = int_to_ptr.vmem [resolvable:$true] %s342_s1 }
  0xa0   : > { %s2005_s2 = scalar_select %p46_p8, %s1702_s29, %s48_s13  }
  0xa1   : > { %s1281_s9 = sshll.u32 %s339_s3, 7  ;;  %p2013_p6 = pnand %p1365_p2, %p1992_p10 }
  0xa2   : > { %s2020_s22 = scalar_lea.hbm %s2407_s0, %s1281_s9  ;;  %s2022_s13 = scalar_lea.sflag [#allocation3], %s329_s23 }
  0xa3   : > { %s1582_s25 = scalar_lea.hbm %s2020_s22, 512  ;;  %p1584_p3 = pneg %p2013_p6 }
  0xa4   : > { %p1583_p0 = scmp.ne.s32.totalorder %s2020_s22, %s1582_s25  ;;  %s1587_s5 = scalar_lea.hbm %s2407_s0, 4096 }
  0xa5   : > { %p1588_p12 = scmp.lt.u32.totalorder %s2020_s22, %s2407_s0  ;;  %p1589_p9 = scmp.lt.u32.totalorder %s1587_s5, %s1582_s25 }
  0xa6   : > { %p1585_p5 = pnand %p1584_p3, %p1583_p0  ;;  %p1591_p13 = scmp.lt.u32.totalorder %s1582_s25, %s2020_s22 }
  0xa7   : > { %p1590_p11 = por %p1589_p9, %p1588_p12 }
  0xa8   : > { %p1586_p7 = pneg %p1585_p5 }
  0xa9   : > { %p1592_p1 = por %p1591_p13, %p1590_p11 }
  0xab   : > { %p1593_p10 = pnand %p1592_p1, %p1586_p7 }
  0xad   : > { %1596 = shalt.err (!%p1593_p10)
}
  0xae   : > { %s1597_s23 = scalar_lea.vmem %s2007_s1, 512  ;;  %s1731_s26 = smov [#allocation2]  }
  0xaf   : > { %p1598_p2 = scmp.ne.s32.totalorder %s2007_s1, %s1597_s23  ;;  %s1602_s16 = sshll.u32 %s1731_s26, 4  ;;  %s1603_s16 = int_to_ptr.vmem [resolvable:$false] %s1602_s16 }
  0xb0   : > { %s1604_s24 = scalar_lea.vmem %s1603_s16, 1024  ;;  %p1605_p5 = scmp.lt.s32.totalorder %s2007_s1, %s1603_s16 }
  0xb1   : > { %p1600_p8 = pnand %p1598_p2, %p1584_p3  ;;  %p1606_p12 = scmp.lt.s32.totalorder %s1604_s24, %s1597_s23 }
  0xb3   : > { %p1601_p0 = pneg %p1600_p8  ;;  %p1607_p9 = por %p1606_p12, %p1605_p5 }
  0xb5   : > { %p1608_p11 = pnand %p1607_p9, %p1601_p0 }
  0xb7   : > { %1611 = shalt.err (!%p1608_p11)
}
  0xb8   : > { %s1732_s3 = smov 1024   ;;  %s1733_s9 = smov 256  }
  0xb9   : > { %s1734_s25 = smov 16   ;;  %p2448_p3 = scmp.ne.s32.totalorder %s2438_s19, 0 }
  0xba   : > { %1355 = dma.hbm_to_vmem [thread:$0]  (!%p2013_p6), %s2020_s22, 512, %s2007_s1, %s2022_s13, %s1732_s3, %s1733_s9, %s1734_s25  }
  0xbb   : > { %354 = sbr.rel (%p2448_p3) target bundleno = 2084 (0x824), region = 52  ;;  %s2053_s20 = sand.u32 (!%p2448_p3), 1, %s1698_s28  }
  0xbc   : > { %s1283_s4 = sshll.u32 (!%p2448_p3), %s2053_s20, 5  ;;  %s357_s5 = scalar_lea.sflag (!%p2448_p3), [#allocation3], %s2053_s20 }
  0xbd   : > { %s360_s27 = scalar_lea.vmem (!%p2448_p3), [#allocation2], %s1283_s4  ;;  %p2449_p7 = scmp.ne.s32.totalorder (!%p2448_p3), %s2435_s17, 0 }
  0xc2   : > { %1673 = dma.done.wait (%p2449_p7), %s357_s5, 512  }
  0xc3   : > { %1675 = vsyncadd (%p2449_p7), %s357_s5, 4294966784  ;;  %p2450_p6 = scmp.ne.s32.totalorder %s2433_s15, 0 }
  0xc5   : > { %1677 = dma.done.wait (%p2450_p6), [#allocation7], 768  }
  0xc6   : > { %1679 = vsyncadd (%p2450_p6), [#allocation7], 4294966528 }
  0xc7   : > { %1681 = dma.done.wait (%p2450_p6), [#allocation10], 512  }
  0xc8   : > { %1683 = vsyncadd (%p2450_p6), [#allocation10], 4294966784 }
  0xc9   : > { %1685 = dma.done.wait (%p2450_p6), [#allocation5], 16  }
  0xca   : > { %1687 = vsyncadd (%p2450_p6), [#allocation5], 4294967280 }
  0xcb   : > { %385 = sfence }
  0xcc   : > { %v2075_v0 = vld [vmem:[%s360_s27 + $0x8] sm:$0xff]  ;;  %v2077_v1 = vld [vmem:[%s360_s27 + $0x18] sm:$0xff]  ;;  %v2079_v2 = vld [vmem:[%s360_s27] sm:$0xff]  ;;  %v1735_v5 = vmov 0   ;;  %s2451_s19 = sld [smem:[#allocation23_spill]]  ;;  %vm471_vm0 = vcmask 130048  }
  0xcd   : > { %v440_v3 = vpack.c.bf16 %v2077_v1, %v2075_v0  ;;  %v2083_v4 = vld [vmem:[%s360_s27 + $0x10] sm:$0xff]  ;;  %510 = vmatprep.mubr.bf16.mxu0 %v1735_v5  ;;  %1450 = vset.pattern.permute.xlu0 %v1735_v5  ;;  %v427_v8 = vld [vmem:[#allocation6] sm:$0xff]  ;;  %v428_v10 = vld [vmem:[#allocation6 + $0x8] sm:$0xff]  ;;  %s437_s22 = sld [smem:[#allocation12]]  ;;  %s2452_s23 = sld [smem:[#allocation25_spill]]  ;;  %vm575_vm9 = vcmask 261120  }
  0xce   : > { %v439_v6 = vpack.c.bf16 %v2083_v4, %v2079_v2  ;;  %1451 = vset.pattern.permute.xlu1 %v1735_v5  ;;  %611 = vmatprep.mubr.bf16.mxu1 %v1735_v5  ;;  %v429_v9 = vld [vmem:[#allocation6 + $0x10] sm:$0xff]  ;;  %v430_v11 = vld [vmem:[#allocation6 + $0x18] sm:$0xff]  ;;  %v431_v12 = vld [vmem:[#allocation8] sm:$0xff]  ;;  %s1290_s26 = sld [smem:[#allocation12 + $0x1]]  ;;  %s2454_s24 = sld [smem:[#allocation21_spill]] }
  0xcf   : > { %478 = vmatprep.subr.bf16.mxu0 %v440_v3  ;;  %443 = vperm.xlu0 %1450, %v427_v8   ;;  %v432_v13 = vld [vmem:[#allocation8 + $0x8] sm:$0xff]  ;;  %v433_v15 = vld [vmem:[#allocation9] sm:$0xff]  ;;  %v434_v16 = vld [vmem:[#allocation9 + $0x8] sm:$0xff]  ;;  %s2453_s16 = sld [smem:[#allocation20_spill]]  ;;  %s413_s5 = scalar_lea.vmem [#allocation13], %s1283_s4 }
  0xd0   : > { %479 = vmatpush1.bf16.msra.mxu0 %v439_v6  ;;  %453 = vperm.xlu1 %1451, %v429_v9   ;;  %v435_v17 = vld [vmem:[#allocation11] sm:$0xff]  ;;  %v436_v18 = vld [vmem:[#allocation11 + $0x8] sm:$0xff]  ;;  %s1129_s27 = sshll.u32 %s413_s5, 4  ;;  %s2455_s1 = sld [smem:[#allocation28_spill]]  ;;  %s2344_s27 = int_to_ptr.vmem [resolvable:$true] %s1129_s27 }
  0xd1   : > { %s1612_s13 = scalar_lea.vmem %s2344_s27, 512  ;;  %s1736_s21 = smov [#allocation13]  }
  0xd2   : > { %v2094_v7 = vld [vmem:[%s2451_s19] sm:$0xff]   ;;  %v2102_v14 = vld [vmem:[%s2451_s19 + $0x8] sm:$0xff]   ;;  %p1613_p13 = scmp.ne.s32.totalorder %s2344_s27, %s1612_s13 }
  0xd3   : > { %1293 = vmatmul.mubr.msk.bf16.vlgmr.msra.gmra.mrb[0].mxu0 %vm471_vm0, %v2094_v7  ;;  %448 = vperm.xlu0 %1450, %v428_v10   ;;  %v2109_v21 = vstv %s437_s22  ;;  %v2136_v60 = vld [vmem:[%s2452_s23] sm:$0xff]   ;;  %s1114_s22 = scalar_lea.sflag [#allocation4], %s2053_s20  ;;  %s1616_s23 = sshll.u32 %s1736_s21, 4  ;;  %s1617_s23 = int_to_ptr.vmem [resolvable:$false] %s1616_s23 }
  0xd4   : > { %520 = vmatprep.mubr.bf16.mxu0 %v1735_v5  ;;  %458 = vperm.xlu1 %1451, %v430_v11   ;;  %s1308_s9 = sshll.u32 %s2454_s24, 4  ;;  %p1614_p1 = pnand %p1613_p13, %p1988_p4 }
  0xd5   : > { %s1307_s3 = sshll.u32 %s2453_s16, 1  ;;  %p1619_p2 = scmp.lt.s32.totalorder %s2344_s27, %s1617_s23 }
  0xd6   : > { %s1126_s25 = sadd.s32 %s1308_s9, %s1307_s3  ;;  %p1615_p10 = pneg %p1614_p1 }
  0xd7   : > { %562 = vperm.xlu0 %1450, %v431_v12   ;;  %s1309_s15 = sshll.u32 %s1126_s25, 7 }
  0xd8   : > { %567 = vperm.xlu1 %1451, %v432_v13   ;;  %s2352_s14 = scalar_lea.hbm %s2455_s1, %s1309_s15 }
  0xdb   : > { %1294 = vmatmul.mubr.msk.bf16.gmra.mrb[4].mxu0 %vm471_vm0, %v2102_v14  ;;  %632 = vperm.xlu0 %1450, %v433_v15  }
  0xdc   : > { %786 = vmatprep.mubr.bf16.mxu0 %v1735_v5  ;;  %637 = vperm.xlu1 %1451, %v434_v16  }
  0xdf   : > { %646 = vperm.xlu0 %1450, %v435_v17  }
  0xe0   : > { %651 = vperm.xlu1 %1451, %v436_v18  }
 0x14e   : > { %v2107_v19 = vpop.permute.xlu0 %443 }
 0x14f   : > { %v2117_v30 = vpop.permute.xlu1 %453 }
 0x152   : > { %v2112_v24 = vpop.permute.xlu0 %448 }
 0x153   : > { %v2124_v44 = vpop.permute.xlu1 %458 }
 0x156   : > { %v2141_v61 = vpop.permute.xlu0 %562 }
 0x157   : > { %v2143_v62 = vpop.permute.xlu1 %567 }
 0x15a   : > { %v2146_v8 = vpop.permute.xlu0 %632 }
 0x15b   : > { %v2151_v15 = vpop.permute.xlu1 %637 }
 0x1a6   : > { %v512_v20 = vpop.f32.mrb[0].mxu0 }
 0x1a7   : > { %v513_v22 = vadd.f32 %v512_v20, %v2107_v19  ;;  %v514_v23 = vpop.f32.mrb[1].mxu0 }
 0x1a8   : > { %v515_v25 = vadd.f32 %v514_v23, %v2107_v19  ;;  %v516_v26 = vpop.f32.mrb[2].mxu0 }
 0x1a9   : > { %v540_v27 = vmul.f32 %v2109_v21, %v513_v22  ;;  %v517_v28 = vadd.f32 %v516_v26, %v2112_v24  ;;  %v518_v29 = vpop.f32.mrb[3].mxu0  ;;  %vm531_vm1 = vcmp.ge.f32.partialorder %v513_v22, 0.0 }
 0x1aa   : > { %v541_v31 = vmul.f32 %v2109_v21, %v515_v25  ;;  %v519_v32 = vadd.f32 %v518_v29, %v2112_v24  ;;  %vm532_vm2 = vcmp.ge.f32.partialorder %v515_v25, 0.0 }
 0x1ab   : > { %v542_v33 = vmul.f32 %v2109_v21, %v517_v28  ;;  %vm533_vm3 = vcmp.ge.f32.partialorder %v517_v28, 0.0  ;;  %v548_v35 = vsel %vm531_vm1, %v513_v22, %v540_v27  ;;  %v2161_v27 = vpop.permute.xlu0 %646 }
 0x1ac   : > { %v543_v34 = vmul.f32 %v2109_v21, %v519_v32  ;;  %vm534_vm4 = vcmp.ge.f32.partialorder %v519_v32, 0.0  ;;  %v549_v38 = vsel %vm532_vm2, %v515_v25, %v541_v31 }
 0x1ad   : > { %v550_v36 = vsel %vm533_vm3, %v517_v28, %v542_v33  ;;  %v2167_v33 = vstv %s1290_s26  ;;  %s1618_s26 = scalar_lea.vmem %s1617_s23, 1024 }
 0x1ae   : > { %v522_v37 = vpop.f32.mrb[4].mxu0  ;;  %v551_v39 = vsel %vm534_vm4, %v519_v32, %v543_v34  ;;  %v556_v40 = vpack.c.bf16 %v550_v36, %v548_v35  ;;  %v2169_v34 = vpop.permute.xlu1 %651  ;;  %p1620_p8 = scmp.lt.s32.totalorder %s1618_s26, %s1612_s13 }
 0x1af   : > { %v523_v41 = vadd.f32 %v522_v37, %v2117_v30  ;;  %v524_v42 = vpop.f32.mrb[5].mxu0  ;;  %v557_v43 = vpack.c.bf16 %v551_v39, %v549_v38 }
 0x1b0   : > { %v525_v45 = vadd.f32 %v524_v42, %v2117_v30  ;;  %v526_v46 = vpop.f32.mrb[6].mxu0  ;;  %p1621_p0 = por %p1620_p8, %p1619_p2 }
 0x1b1   : > { %v544_v47 = vmul.f32 %v2109_v21, %v523_v41  ;;  %v527_v48 = vadd.f32 %v526_v46, %v2124_v44  ;;  %v528_v49 = vpop.f32.mrb[7].mxu0  ;;  %579 = vmatprep.subr.bf16.mxu1 %v557_v43  ;;  %vm535_vm5 = vcmp.ge.f32.partialorder %v523_v41, 0.0 }
 0x1b2   : > { %v545_v50 = vmul.f32 %v2109_v21, %v525_v45  ;;  %v529_v51 = vadd.f32 %v528_v49, %v2124_v44  ;;  %580 = vmatpush1.bf16.msra.mxu1 %v556_v40  ;;  %vm536_vm6 = vcmp.ge.f32.partialorder %v525_v45, 0.0  ;;  %p1622_p5 = pnand %p1621_p0, %p1615_p10 }
 0x1b3   : > { %vm537_vm7 = vcmp.ge.f32.partialorder %v527_v48, 0.0  ;;  %v546_v52 = vmul.f32 %v2109_v21, %v527_v48  ;;  %v552_v54 = vsel %vm535_vm5, %v523_v41, %v544_v47 }
 0x1b4   : > { %vm538_vm8 = vcmp.ge.f32.partialorder %v529_v51, 0.0  ;;  %v547_v53 = vmul.f32 %v2109_v21, %v529_v51  ;;  %v553_v56 = vsel %vm536_vm6, %v525_v45, %v545_v50 }
 0x1b5   : > { %v554_v55 = vsel %vm537_vm7, %v527_v48, %v546_v52 }
 0x1b6   : > { %v555_v57 = vsel %vm538_vm8, %v529_v51, %v547_v53  ;;  %v558_v58 = vpack.c.bf16 %v554_v55, %v552_v54 }
 0x1b7   : > { %v559_v59 = vpack.c.bf16 %v555_v57, %v553_v56 }
 0x1b9   : > { %581 = vmatprep.subr.bf16.mxu1 %v559_v59 }
 0x1ba   : > { %582 = vmatpush1.bf16.msra.mxu1 %v558_v58 }
 0x1bd   : > { %1296 = vmatmul.mubr.msk.bf16.vlgmr.msra.gmra.mrb[0].mxu1 %vm575_vm9, %v2136_v60 }
 0x1be   : > { %705 = vmatprep.mubr.bf16.mxu1 %v1735_v5 }
 0x290   : > { %v613_v63 = vpop.f32.mrb[0].mxu1 }
 0x291   : > { %v614_v3 = vadd.f32 %v613_v63, %v2141_v61  ;;  %v615_v6 = vpop.f32.mrb[1].mxu1 }
 0x292   : > { %v616_v9 = vadd.f32 %v615_v6, %v2141_v61  ;;  %v617_v10 = vpop.f32.mrb[2].mxu1 }
 0x293   : > { %v622_v11 = vadd.f32 %v614_v3, %v2079_v2  ;;  %v618_v12 = vadd.f32 %v617_v10, %v2143_v62  ;;  %v619_v13 = vpop.f32.mrb[3].mxu1 }
 0x294   : > { %v623_v16 = vadd.f32 %v616_v9, %v2075_v0  ;;  %v620_v17 = vadd.f32 %v619_v13, %v2143_v62 }
 0x295   : > { %v626_v18 = vadd.f32 %v622_v11, %v2079_v2  ;;  %v624_v20 = vadd.f32 %v618_v12, %v2083_v4 }
 0x296   : > { %v627_v22 = vadd.f32 %v623_v16, %v2075_v0  ;;  %v625_v23 = vadd.f32 %v620_v17, %v2077_v1 }
 0x297   : > { %v640_v25 = vmul.f32 %v2146_v8, %v626_v18  ;;  %v628_v26 = vadd.f32 %v624_v20, %v2083_v4 }
 0x298   : > { %v641_v28 = vmul.f32 %v2146_v8, %v627_v22  ;;  %v629_v29 = vadd.f32 %v625_v23, %v2077_v1 }
 0x299   : > { %v654_v31 = vadd.f32 %v2161_v27, %v640_v25  ;;  %v642_v32 = vmul.f32 %v2151_v15, %v628_v26 }
 0x29a   : > { %v655_v35 = vadd.f32 %v2161_v27, %v641_v28  ;;  %v643_v36 = vmul.f32 %v2151_v15, %v629_v29 }
 0x29b   : > { %v656_v37 = vadd.f32 %v2169_v34, %v642_v32  ;;  %v663_v40 = vmul.f32 %v2167_v33, %v654_v31  ;;  %vm658_vm13 = vcmp.ge.f32.partialorder %v654_v31, 0.0 }
 0x29c   : > { %v657_v38 = vadd.f32 %v2169_v34, %v643_v36  ;;  %v664_v39 = vmul.f32 %v2167_v33, %v655_v35  ;;  %vm659_vm10 = vcmp.ge.f32.partialorder %v655_v35, 0.0 }
 0x29d   : > { %vm660_vm11 = vcmp.ge.f32.partialorder %v656_v37, 0.0  ;;  %v665_v41 = vmul.f32 %v2167_v33, %v656_v37  ;;  %v2187_v48 = vsel %vm658_vm13, %v654_v31, %v663_v40 }
 0x29e   : > { %vm661_vm12 = vcmp.ge.f32.partialorder %v657_v38, 0.0  ;;  %v666_v42 = vmul.f32 %v2167_v33, %v657_v38  ;;  %v2181_v45 = vsel %vm659_vm10, %v655_v35, %v664_v39 }
 0x29f   : > { %v2179_v43 = vsel %vm660_vm11, %v656_v37, %v665_v41 }
 0x2a0   : > { %v2183_v46 = vsel %vm661_vm12, %v657_v38, %v666_v42  ;;  %v671_v49 = vpack.c.bf16 %v2179_v43, %v2187_v48 }
 0x2a1   : > { %v672_v47 = vpack.c.bf16 %v2183_v46, %v2181_v45 }
 0x2a3   : > { %673 = vmatprep.subr.bf16.mxu1 %v672_v47 }
 0x2a4   : > { %674 = vmatpush1.bf16.msra.mxu1 %v671_v49 }
 0x2a7   : > { %1297 = vmatmul.mubr.msk.bf16.vlgmr.msra.gmra.mrb[4].mxu1 %vm471_vm0, %v2094_v7 }
 0x2a8   : > { %715 = vmatprep.mubr.bf16.mxu1 %v1735_v5 }
 0x2af   : > { %1298 = vmatmul.mubr.msk.bf16.gmra.mrb[8].mxu1 %vm471_vm0, %v2102_v14 }
 0x2b0   : > { %940 = vmatprep.mubr.bf16.mxu1 %v1735_v5 }
 0x37a   : > { %v707_v50 = vpop.f32.mrb[4].mxu1 }
 0x37b   : > { %v708_v51 = vadd.f32 %v707_v50, %v2107_v19  ;;  %v709_v52 = vpop.f32.mrb[5].mxu1 }
 0x37c   : > { %v710_v53 = vadd.f32 %v709_v52, %v2107_v19  ;;  %v711_v54 = vpop.f32.mrb[6].mxu1 }
 0x37d   : > { %v734_v55 = vmul.f32 %v708_v51, %v2109_v21  ;;  %v712_v56 = vadd.f32 %v711_v54, %v2112_v24  ;;  %v713_v57 = vpop.f32.mrb[7].mxu1  ;;  %vm726_vm14 = vcmp.ge.f32.partialorder %v708_v51, 0.0 }
 0x37e   : > { %v735_v58 = vmul.f32 %v710_v53, %v2109_v21  ;;  %v714_v59 = vadd.f32 %v713_v57, %v2112_v24  ;;  %vm727_vm15 = vcmp.ge.f32.partialorder %v710_v53, 0.0 }
 0x37f   : > { %vm728_vm1 = vcmp.ge.f32.partialorder %v712_v56, 0.0  ;;  %v736_v63 = vmul.f32 %v712_v56, %v2109_v21  ;;  %v742_v6 = vsel %vm726_vm14, %v708_v51, %v734_v55 }
 0x380   : > { %vm729_vm2 = vcmp.ge.f32.partialorder %v714_v59, 0.0  ;;  %v737_v3 = vmul.f32 %v714_v59, %v2109_v21  ;;  %v743_v12 = vsel %vm727_vm15, %v710_v53, %v735_v58 }
 0x381   : > { %v744_v9 = vsel %vm728_vm1, %v712_v56, %v736_v63 }
 0x382   : > { %v750_v10 = vpack.c.bf16 %v744_v9, %v742_v6  ;;  %v717_v11 = vpop.f32.mrb[8].mxu1  ;;  %v745_v13 = vsel %vm729_vm2, %v714_v59, %v737_v3 }
 0x383   : > { %v718_v16 = vadd.f32 %v717_v11, %v2117_v30  ;;  %v719_v17 = vpop.f32.mrb[9].mxu1  ;;  %v751_v18 = vpack.c.bf16 %v745_v13, %v743_v12 }
 0x384   : > { %v720_v20 = vadd.f32 %v719_v17, %v2117_v30  ;;  %v721_v22 = vpop.f32.mrb[10].mxu1 }
 0x385   : > { %v738_v23 = vmul.f32 %v718_v16, %v2109_v21  ;;  %v722_v25 = vadd.f32 %v721_v22, %v2124_v44  ;;  %v723_v26 = vpop.f32.mrb[11].mxu1  ;;  %754 = vmatprep.subr.bf16.mxu0 %v751_v18  ;;  %vm730_vm3 = vcmp.ge.f32.partialorder %v718_v16, 0.0 }
 0x386   : > { %v739_v28 = vmul.f32 %v720_v20, %v2109_v21  ;;  %v724_v29 = vadd.f32 %v723_v26, %v2124_v44  ;;  %755 = vmatpush1.bf16.msra.mxu0 %v750_v10  ;;  %vm731_vm4 = vcmp.ge.f32.partialorder %v720_v20, 0.0 }
 0x387   : > { %vm732_vm5 = vcmp.ge.f32.partialorder %v722_v25, 0.0  ;;  %v740_v31 = vmul.f32 %v722_v25, %v2109_v21  ;;  %v746_v35 = vsel %vm730_vm3, %v718_v16, %v738_v23 }
 0x388   : > { %vm733_vm6 = vcmp.ge.f32.partialorder %v724_v29, 0.0  ;;  %v741_v32 = vmul.f32 %v724_v29, %v2109_v21  ;;  %v747_v38 = vsel %vm731_vm4, %v720_v20, %v739_v28 }
 0x389   : > { %v748_v36 = vsel %vm732_vm5, %v722_v25, %v740_v31 }
 0x38a   : > { %v752_v37 = vpack.c.bf16 %v748_v36, %v746_v35  ;;  %v749_v39 = vsel %vm733_vm6, %v724_v29, %v741_v32 }
 0x38b   : > { %v753_v40 = vpack.c.bf16 %v749_v39, %v747_v38 }
 0x38d   : > { %756 = vmatprep.subr.bf16.mxu0 %v753_v40 }
 0x38e   : > { %757 = vmatpush1.bf16.msra.mxu0 %v752_v37 }
 0x391   : > { %1299 = vmatmul.mubr.msk.bf16.vlgmr.msra.gmra.mrb[8].mxu0 %vm575_vm9, %v2136_v60 }
 0x392   : > { %859 = vmatprep.mubr.bf16.mxu0 %v1735_v5 }
 0x464   : > { %v788_v41 = vpop.f32.mrb[8].mxu0 }
 0x465   : > { %v789_v42 = vadd.f32 %v788_v41, %v2141_v61  ;;  %v790_v47 = vpop.f32.mrb[9].mxu0 }
 0x466   : > { %v791_v49 = vadd.f32 %v790_v47, %v2141_v61  ;;  %v792_v50 = vpop.f32.mrb[10].mxu0 }
 0x467   : > { %v797_v51 = vadd.f32 %v789_v42, %v2187_v48  ;;  %v793_v52 = vadd.f32 %v792_v50, %v2143_v62  ;;  %v794_v53 = vpop.f32.mrb[11].mxu0 }
 0x468   : > { %v798_v54 = vadd.f32 %v791_v49, %v2181_v45  ;;  %v795_v55 = vadd.f32 %v794_v53, %v2143_v62 }
 0x469   : > { %v801_v56 = vadd.f32 %v797_v51, %v2079_v2  ;;  %v799_v57 = vadd.f32 %v793_v52, %v2179_v43 }
 0x46a   : > { %v802_v58 = vadd.f32 %v798_v54, %v2075_v0  ;;  %v800_v59 = vadd.f32 %v795_v55, %v2183_v46 }
 0x46b   : > { %v805_v63 = vmul.f32 %v801_v56, %v2146_v8  ;;  %v803_v3 = vadd.f32 %v799_v57, %v2083_v4 }
 0x46c   : > { %v806_v48 = vmul.f32 %v802_v58, %v2146_v8  ;;  %v804_v6 = vadd.f32 %v800_v59, %v2077_v1 }
 0x46d   : > { %v809_v45 = vadd.f32 %v805_v63, %v2161_v27  ;;  %v807_v9 = vmul.f32 %v803_v3, %v2151_v15 }
 0x46e   : > { %v810_v10 = vadd.f32 %v806_v48, %v2161_v27  ;;  %v808_v43 = vmul.f32 %v804_v6, %v2151_v15 }
 0x46f   : > { %v811_v11 = vadd.f32 %v807_v9, %v2169_v34  ;;  %v817_v13 = vmul.f32 %v809_v45, %v2167_v33  ;;  %vm813_vm11 = vcmp.ge.f32.partialorder %v809_v45, 0.0 }
 0x470   : > { %v812_v46 = vadd.f32 %v808_v43, %v2169_v34  ;;  %v818_v12 = vmul.f32 %v810_v10, %v2167_v33  ;;  %vm814_vm7 = vcmp.ge.f32.partialorder %v810_v10, 0.0 }
 0x471   : > { %vm815_vm8 = vcmp.ge.f32.partialorder %v811_v11, 0.0  ;;  %v819_v16 = vmul.f32 %v811_v11, %v2167_v33  ;;  %v2248_v25 = vsel %vm813_vm11, %v809_v45, %v817_v13 }
 0x472   : > { %vm816_vm10 = vcmp.ge.f32.partialorder %v812_v46, 0.0  ;;  %v820_v17 = vmul.f32 %v812_v46, %v2167_v33  ;;  %v2242_v20 = vsel %vm814_vm7, %v810_v10, %v818_v12 }
 0x473   : > { %v2240_v18 = vsel %vm815_vm8, %v811_v11, %v819_v16 }
 0x474   : > { %v2244_v22 = vsel %vm816_vm10, %v812_v46, %v820_v17  ;;  %v825_v26 = vpack.c.bf16 %v2240_v18, %v2248_v25 }
 0x475   : > { %v826_v23 = vpack.c.bf16 %v2244_v22, %v2242_v20 }
 0x477   : > { %827 = vmatprep.subr.bf16.mxu0 %v826_v23 }
 0x478   : > { %828 = vmatpush1.bf16.msra.mxu0 %v825_v26 }
 0x47b   : > { %1300 = vmatmul.mubr.msk.bf16.vlgmr.msra.gmra.mrb[12].mxu0 %vm471_vm0, %v2094_v7 }
 0x47c   : > { %869 = vmatprep.mubr.bf16.mxu0 %v1735_v5 }
 0x483   : > { %1301 = vmatmul.mubr.msk.bf16.gmra.mrb[16].mxu0 %vm471_vm0, %v2102_v14 }
 0x484   : > { %1094 = vmatprep.mubr.bf16.mxu0 %v1735_v5 }
 0x54e   : > { %v861_v28 = vpop.f32.mrb[12].mxu0 }
 0x54f   : > { %v862_v29 = vadd.f32 %v861_v28, %v2107_v19  ;;  %v863_v31 = vpop.f32.mrb[13].mxu0 }
 0x550   : > { %v864_v32 = vadd.f32 %v863_v31, %v2107_v19  ;;  %v865_v35 = vpop.f32.mrb[14].mxu0 }
 0x551   : > { %v888_v36 = vmul.f32 %v862_v29, %v2109_v21  ;;  %v866_v37 = vadd.f32 %v865_v35, %v2112_v24  ;;  %v867_v38 = vpop.f32.mrb[15].mxu0  ;;  %vm880_vm12 = vcmp.ge.f32.partialorder %v862_v29, 0.0 }
 0x552   : > { %v889_v39 = vmul.f32 %v864_v32, %v2109_v21  ;;  %v868_v40 = vadd.f32 %v867_v38, %v2112_v24  ;;  %vm881_vm13 = vcmp.ge.f32.partialorder %v864_v32, 0.0 }
 0x553   : > { %vm882_vm14 = vcmp.ge.f32.partialorder %v866_v37, 0.0  ;;  %v890_v41 = vmul.f32 %v866_v37, %v2109_v21  ;;  %v896_v47 = vsel %vm880_vm12, %v862_v29, %v888_v36 }
 0x554   : > { %vm883_vm15 = vcmp.ge.f32.partialorder %v868_v40, 0.0  ;;  %v891_v42 = vmul.f32 %v868_v40, %v2109_v21  ;;  %v897_v52 = vsel %vm881_vm13, %v864_v32, %v889_v39 }
 0x555   : > { %v898_v49 = vsel %vm882_vm14, %v866_v37, %v890_v41 }
 0x556   : > { %v904_v50 = vpack.c.bf16 %v898_v49, %v896_v47  ;;  %v871_v51 = vpop.f32.mrb[16].mxu0  ;;  %v899_v53 = vsel %vm883_vm15, %v868_v40, %v891_v42 }
 0x557   : > { %v872_v54 = vadd.f32 %v871_v51, %v2117_v30  ;;  %v873_v55 = vpop.f32.mrb[17].mxu0  ;;  %v905_v56 = vpack.c.bf16 %v899_v53, %v897_v52 }
 0x558   : > { %v874_v57 = vadd.f32 %v873_v55, %v2117_v30  ;;  %v875_v58 = vpop.f32.mrb[18].mxu0 }
 0x559   : > { %v892_v59 = vmul.f32 %v872_v54, %v2109_v21  ;;  %v876_v63 = vadd.f32 %v875_v58, %v2124_v44  ;;  %v877_v3 = vpop.f32.mrb[19].mxu0  ;;  %908 = vmatprep.subr.bf16.mxu1 %v905_v56  ;;  %vm884_vm1 = vcmp.ge.f32.partialorder %v872_v54, 0.0 }
 0x55a   : > { %v893_v48 = vmul.f32 %v874_v57, %v2109_v21  ;;  %v878_v6 = vadd.f32 %v877_v3, %v2124_v44  ;;  %909 = vmatpush1.bf16.msra.mxu1 %v904_v50  ;;  %vm885_vm2 = vcmp.ge.f32.partialorder %v874_v57, 0.0 }
 0x55b   : > { %vm886_vm3 = vcmp.ge.f32.partialorder %v876_v63, 0.0  ;;  %v894_v45 = vmul.f32 %v876_v63, %v2109_v21  ;;  %v900_v10 = vsel %vm884_vm1, %v872_v54, %v892_v59 }
 0x55c   : > { %vm887_vm4 = vcmp.ge.f32.partialorder %v878_v6, 0.0  ;;  %v895_v9 = vmul.f32 %v878_v6, %v2109_v21  ;;  %v901_v46 = vsel %vm885_vm2, %v874_v57, %v893_v48 }
 0x55d   : > { %v902_v43 = vsel %vm886_vm3, %v876_v63, %v894_v45 }
 0x55e   : > { %v906_v11 = vpack.c.bf16 %v902_v43, %v900_v10  ;;  %v903_v12 = vsel %vm887_vm4, %v878_v6, %v895_v9 }
 0x55f   : > { %v907_v13 = vpack.c.bf16 %v903_v12, %v901_v46 }
 0x561   : > { %910 = vmatprep.subr.bf16.mxu1 %v907_v13 }
 0x562   : > { %911 = vmatpush1.bf16.msra.mxu1 %v906_v11 }
 0x565   : > { %1302 = vmatmul.mubr.msk.bf16.vlgmr.msra.gmra.mrb[12].mxu1 %vm575_vm9, %v2136_v60 }
 0x566   : > { %1013 = vmatprep.mubr.bf16.mxu1 %v1735_v5 }
 0x638   : > { %v942_v16 = vpop.f32.mrb[12].mxu1 }
 0x639   : > { %v943_v17 = vadd.f32 %v942_v16, %v2141_v61  ;;  %v944_v23 = vpop.f32.mrb[13].mxu1 }
 0x63a   : > { %v945_v26 = vadd.f32 %v944_v23, %v2141_v61  ;;  %v946_v28 = vpop.f32.mrb[14].mxu1 }
 0x63b   : > { %v951_v29 = vadd.f32 %v943_v17, %v2248_v25  ;;  %v947_v31 = vadd.f32 %v946_v28, %v2143_v62  ;;  %v948_v32 = vpop.f32.mrb[15].mxu1 }
 0x63c   : > { %v952_v35 = vadd.f32 %v945_v26, %v2242_v20  ;;  %v949_v36 = vadd.f32 %v948_v32, %v2143_v62 }
 0x63d   : > { %v955_v37 = vadd.f32 %v951_v29, %v2079_v2  ;;  %v953_v38 = vadd.f32 %v947_v31, %v2240_v18 }
 0x63e   : > { %v956_v39 = vadd.f32 %v952_v35, %v2075_v0  ;;  %v954_v40 = vadd.f32 %v949_v36, %v2244_v22 }
 0x63f   : > { %v959_v41 = vmul.f32 %v955_v37, %v2146_v8  ;;  %v957_v42 = vadd.f32 %v953_v38, %v2083_v4 }
 0x640   : > { %v960_v25 = vmul.f32 %v956_v39, %v2146_v8  ;;  %v958_v47 = vadd.f32 %v954_v40, %v2077_v1 }
 0x641   : > { %v963_v20 = vadd.f32 %v959_v41, %v2161_v27  ;;  %v961_v49 = vmul.f32 %v957_v42, %v2151_v15 }
 0x642   : > { %v964_v2 = vadd.f32 %v960_v25, %v2161_v27  ;;  %v962_v18 = vmul.f32 %v958_v47, %v2151_v15 }
 0x643   : > { %v965_v0 = vadd.f32 %v961_v49, %v2169_v34  ;;  %v971_v4 = vmul.f32 %v963_v20, %v2167_v33  ;;  %vm967_vm8 = vcmp.ge.f32.partialorder %v963_v20, 0.0 }
 0x644   : > { %v966_v22 = vadd.f32 %v962_v18, %v2169_v34  ;;  %v972_v50 = vmul.f32 %v964_v2, %v2167_v33  ;;  %vm968_vm5 = vcmp.ge.f32.partialorder %v964_v2, 0.0 }
 0x645   : > { %vm969_vm6 = vcmp.ge.f32.partialorder %v965_v0, 0.0  ;;  %v973_v1 = vmul.f32 %v965_v0, %v2167_v33  ;;  %v2309_v52 = vsel %vm967_vm8, %v963_v20, %v971_v4 }
 0x646   : > { %vm970_vm7 = vcmp.ge.f32.partialorder %v966_v22, 0.0  ;;  %v974_v8 = vmul.f32 %v966_v22, %v2167_v33  ;;  %v2303_v27 = vsel %vm968_vm5, %v964_v2, %v972_v50 }
 0x647   : > { %v2301_v51 = vsel %vm969_vm6, %v965_v0, %v973_v1 }
 0x648   : > { %v2305_v15 = vsel %vm970_vm7, %v966_v22, %v974_v8  ;;  %v979_v53 = vpack.c.bf16 %v2301_v51, %v2309_v52 }
 0x649   : > { %v980_v34 = vpack.c.bf16 %v2305_v15, %v2303_v27 }
 0x64b   : > { %981 = vmatprep.subr.bf16.mxu1 %v980_v34 }
 0x64c   : > { %982 = vmatpush1.bf16.msra.mxu1 %v979_v53 }
 0x64f   : > { %1303 = vmatmul.mubr.msk.bf16.vlgmr.msra.gmra.mrb[16].mxu1 %vm471_vm0, %v2094_v7 }
 0x650   : > { %1023 = vmatprep.mubr.bf16.mxu1 %v1735_v5 }
 0x657   : > { %1304 = vmatmul.mubr.msk.bf16.gmra.mrb[20].mxu1 %vm471_vm0, %v2102_v14 }
 0x722   : > { %v1015_v33 = vpop.f32.mrb[16].mxu1 }
 0x723   : > { %v1016_v54 = vadd.f32 %v1015_v33, %v2107_v19  ;;  %v1017_v55 = vpop.f32.mrb[17].mxu1 }
 0x724   : > { %v1018_v56 = vadd.f32 %v1017_v55, %v2107_v19  ;;  %v1019_v57 = vpop.f32.mrb[18].mxu1 }
 0x725   : > { %v1042_v58 = vmul.f32 %v1016_v54, %v2109_v21  ;;  %v1020_v59 = vadd.f32 %v1019_v57, %v2112_v24  ;;  %v1021_v63 = vpop.f32.mrb[19].mxu1  ;;  %vm1034_vm10 = vcmp.ge.f32.partialorder %v1016_v54, 0.0 }
 0x726   : > { %v1043_v7 = vmul.f32 %v1018_v56, %v2109_v21  ;;  %v1022_v5 = vadd.f32 %v1021_v63, %v2112_v24  ;;  %vm1035_vm11 = vcmp.ge.f32.partialorder %v1018_v56, 0.0 }
 0x727   : > { %vm1036_vm12 = vcmp.ge.f32.partialorder %v1020_v59, 0.0  ;;  %v1044_v14 = vmul.f32 %v1020_v59, %v2109_v21  ;;  %v1050_v48 = vsel %vm1034_vm10, %v1016_v54, %v1042_v58 }
 0x728   : > { %vm1037_vm0 = vcmp.ge.f32.partialorder %v1022_v5, 0.0  ;;  %v1045_v3 = vmul.f32 %v1022_v5, %v2109_v21  ;;  %v1051_v9 = vsel %vm1035_vm11, %v1018_v56, %v1043_v7 }
 0x729   : > { %v1052_v19 = vsel %vm1036_vm12, %v1020_v59, %v1044_v14 }
 0x72a   : > { %v1058_v6 = vpack.c.bf16 %v1052_v19, %v1050_v48  ;;  %v1025_v45 = vpop.f32.mrb[20].mxu1  ;;  %v1053_v10 = vsel %vm1037_vm0, %v1022_v5, %v1045_v3 }
 0x72b   : > { %v1026_v43 = vadd.f32 %v1025_v45, %v2117_v30  ;;  %v1027_v11 = vpop.f32.mrb[21].mxu1  ;;  %v1059_v46 = vpack.c.bf16 %v1053_v10, %v1051_v9 }
 0x72c   : > { %v1028_v12 = vadd.f32 %v1027_v11, %v2117_v30  ;;  %v1029_v24 = vpop.f32.mrb[22].mxu1 }
 0x72d   : > { %v1046_v13 = vmul.f32 %v1026_v43, %v2109_v21  ;;  %v1030_v16 = vadd.f32 %v1029_v24, %v2124_v44  ;;  %v1031_v17 = vpop.f32.mrb[23].mxu1  ;;  %1062 = vmatprep.subr.bf16.mxu0 %v1059_v46  ;;  %vm1038_vm13 = vcmp.ge.f32.partialorder %v1026_v43, 0.0 }
 0x72e   : > { %v1047_v23 = vmul.f32 %v1028_v12, %v2109_v21  ;;  %v1032_v26 = vadd.f32 %v1031_v17, %v2124_v44  ;;  %1063 = vmatpush1.bf16.msra.mxu0 %v1058_v6  ;;  %vm1039_vm14 = vcmp.ge.f32.partialorder %v1028_v12, 0.0 }
 0x72f   : > { %vm1040_vm15 = vcmp.ge.f32.partialorder %v1030_v16, 0.0  ;;  %v1048_v28 = vmul.f32 %v1030_v16, %v2109_v21  ;;  %v1054_v29 = vsel %vm1038_vm13, %v1026_v43, %v1046_v13 }
 0x730   : > { %vm1041_vm1 = vcmp.ge.f32.partialorder %v1032_v26, 0.0  ;;  %v1049_v30 = vmul.f32 %v1032_v26, %v2109_v21  ;;  %v1055_v35 = vsel %vm1039_vm14, %v1028_v12, %v1047_v23 }
 0x731   : > { %v1056_v31 = vsel %vm1040_vm15, %v1030_v16, %v1048_v28 }
 0x732   : > { %v1060_v32 = vpack.c.bf16 %v1056_v31, %v1054_v29  ;;  %v1057_v36 = vsel %vm1041_vm1, %v1032_v26, %v1049_v30 }
 0x733   : > { %v1061_v37 = vpack.c.bf16 %v1057_v36, %v1055_v35 }
 0x735   : > { %1064 = vmatprep.subr.bf16.mxu0 %v1061_v37 }
 0x736   : > { %1065 = vmatpush1.bf16.msra.mxu0 %v1060_v32 }
 0x739   : > { %1305 = vmatmul.mubr.msk.bf16.vlgmr.msra.gmra.mrb[20].mxu0 %vm575_vm9, %v2136_v60 }
 0x80c   : > { %v1096_v44 = vpop.f32.mrb[20].mxu0 }
 0x80d   : > { %v1097_v38 = vadd.f32 %v1096_v44, %v2141_v61  ;;  %v1098_v21 = vpop.f32.mrb[21].mxu0 }
 0x80e   : > { %v1099_v39 = vadd.f32 %v1098_v21, %v2141_v61  ;;  %v1100_v40 = vpop.f32.mrb[22].mxu0 }
 0x80f   : > { %v1105_v41 = vadd.f32 %v1097_v38, %v2309_v52  ;;  %v1101_v60 = vadd.f32 %v1100_v40, %v2143_v62  ;;  %v1102_v42 = vpop.f32.mrb[23].mxu0 }
 0x810   : > { %v1106_v25 = vadd.f32 %v1099_v39, %v2303_v27  ;;  %v1103_v47 = vadd.f32 %v1102_v42, %v2143_v62 }
 0x811   : > { %1109 = vst [vmem:[%s413_s5] sm:$0xff] %v1105_v41  ;;  %v1107_v61 = vadd.f32 %v1101_v60, %v2301_v51 }
 0x812   : > { %1110 = vst [vmem:[%s413_s5 + $0x8] sm:$0xff] %v1106_v25  ;;  %v1108_v20 = vadd.f32 %v1103_v47, %v2305_v15 }
 0x813   : > { %1111 = vst [vmem:[%s413_s5 + $0x10] sm:$0xff] %v1107_v61 }
 0x814   : > { %1112 = vst [vmem:[%s413_s5 + $0x18] sm:$0xff] %v1108_v20 }
 0x815   : > { %1625 = shalt.err (!%p1622_p5)
}
 0x816   : > { %s1626_s16 = scalar_lea.hbm %s2352_s14, 512  ;;  %s1630_s9 = scalar_lea.hbm %s2455_s1, 4096 }
 0x817   : > { %p1627_p12 = scmp.ne.s32.totalorder %s2352_s14, %s1626_s16  ;;  %p1631_p3 = scmp.lt.u32.totalorder %s2352_s14, %s2455_s1 }
 0x818   : > { %p1632_p7 = scmp.lt.u32.totalorder %s1630_s9, %s1626_s16  ;;  %p1634_p13 = scmp.lt.u32.totalorder %s1626_s16, %s2352_s14 }
 0x819   : > { %p1628_p9 = pnand %p1627_p12, %p1988_p4 }
 0x81a   : > { %p1633_p6 = por %p1632_p7, %p1631_p3 }
 0x81b   : > { %p1629_p11 = pneg %p1628_p9 }
 0x81c   : > { %p1635_p1 = por %p1634_p13, %p1633_p6 }
 0x81e   : > { %p1636_p10 = pnand %p1635_p1, %p1629_p11 }
 0x820   : > { %1639 = shalt.err (!%p1636_p10)
}
 0x821   : > { %s1737_s15 = smov 256   ;;  %s1738_s4 = smov 1024  }
 0x822   : > { %s1739_s17 = smov 16  }
 0x823   : > { %1334 = dma.vmem_to_hbm [thread:$0]  (%p1988_p4), %s2344_s27, 512, %s2352_s14, %s1114_s22, %s1737_s15, %s1738_s4, %s1739_s17  }
 0x824 PF: > { %s2456_s13 = sld [smem:[#allocation19_spill]]  ;;  %s2457_s21 = sld [smem:[#allocation22_spill]] }
 0x825   : > { %p1371_p2 = scmp.ge.s32.totalorder %s1722_s12, 2 }
 0x82a   : > { %s1144_s23 = sand.u32 1, %s2456_s13   ;;  %p2458_p8 = scmp.ne.s32.totalorder %s2457_s21, 0 }
 0x82b   : > { %s1145_s26 = scalar_lea.sflag [#allocation4], %s1144_s23 }
 0x82c   : > { %p1357_p0 = pnand %p1371_p2, %p2458_p8 }
 0x82e   : > { %1689 = dma.done.wait (!%p1357_p0), %s1145_s26, 512  }
 0x82f   : > { %1691 = vsyncadd (!%p1357_p0), %s1145_s26, 4294966784  ;;  %s27_s12 = sadd.s32 1, %s1722_s12   ;;  %s2459_s27 = smov %s1698_s28 }
 0x830   : > { %p24_p5 = scmp.ge.s32.totalorder %s27_s12, 10   ;;  %s2460_s28 = smov %s1702_s29 }
 0x831   : > { %s2461_s29 = smov %s2005_s2  ;;  %s2462_s30 = smov %s1714_s10 }
 0x832   : > { %s2463_s9 = smov %s1718_s11  ;;  %s2464_s10 = smov %s2467_s8 }
 0x833   : > { %s2465_s11 = smov %s2471_s18  ;;  %26 = sbr.rel (!%p24_p5) target bundleno = 17 (0x11), region = 118 }
 0x83a   :  { %1150 = vsyncpa [#allocation3], 1 }
 0x83b   :  { %1152 = vsyncpa [#allocation3 + $0x1], 1 }
 0x83c   :  { %1153 = vsyncpa [#allocation7], 1 }
 0x83d   :  { %1154 = vsyncpa [#allocation10], 1 }
 0x83e   :  { %1155 = vsyncpa [#allocation4], 1 }
 0x83f   :  { %1157 = vsyncpa [#allocation4 + $0x1], 1 }
 0x840   :  { %1158 = vsyncpa [#allocation5], 1 }
 0x841   :  { %1160 = vsyncpa [#allocation5 + $0x1], 1 }

</bundles_post_ra>
